<compile_context>
chip_gen: v7x
topology: tpu7x:2x2x1
jax: 0.10.0
libtpu: 0.0.40
codegen_flags: <defaults>
</compile_context>

<pallas_src>
import jax
import jax.numpy as jnp
from jax import lax
from jax.experimental import pallas as pl
from jax.experimental.pallas import tpu as pltpu


def _round_up(x, m):
    return (x + m - 1) // m * m


def _patch_embed_kernel(p_ref, w_ref, b_ref, o_ref):
    # (tm, K_pad) @ (K_pad, E) on the MXU with f32 accumulation; bias add in
    # f32 (v5e has no bf16 VPU path), final cast to the (bf16) output dtype.
    acc = jnp.dot(p_ref[...], w_ref[...], preferred_element_type=jnp.float32)
    o_ref[...] = (acc + b_ref[...]).astype(o_ref.dtype)


def patch_embed_forward(x, weight, bias, *, patch_size, tile_m=512,
                        compute_dtype=jnp.bfloat16, out_dtype=jnp.bfloat16):
    """x: (B, C, H, W); weight: (E, C, P, P) (PyTorch conv layout); bias: (E,).

    Returns (B, num_patches, E) in `out_dtype`, numerically matching
    Conv2d(stride=P) + flatten(2) + transpose(1, 2) up to bf16 rounding.
    """
    B, C, H, W = x.shape
    P = patch_size
    # Mirrors the module's usage (forward asserts the image size; defaults
    # 20x12 / P=4 divide exactly). Non-divisible inputs are rejected rather
    # than silently cropped like Conv2d(padding=VALID) would.
    assert H % P == 0 and W % P == 0, "input size must match patch grid"
    Hp, Wp = H // P, W // P
    NP = Hp * Wp
    E = weight.shape[0]
    K = C * P * P
    K_pad = _round_up(K, 128)          # lane-dense contraction dim
    M = B * NP                         # batch folded into the GEMM M dim

    # --- im2col: pure layout plumbing (zero FLOPs). Cast to bf16 first so XLA
    # fuses convert + transpose + pad into one pass and the materialized
    # patches buffer (re-read by the kernel) is half-width.
    patches = (x.astype(compute_dtype)
                 .reshape(B, C, Hp, P, Wp, P)
                 .transpose(0, 2, 4, 1, 3, 5)          # (B, Hp, Wp, C, P, P)
                 .reshape(M, K))
    if K_pad != K:
        patches = jnp.pad(patches, ((0, 0), (0, K_pad - K)))

    # Weight: (E, C, P, P) -> (K, E), K-order (c, ph, pw) matches the im2col.
    w_flat = weight.reshape(E, K).T.astype(compute_dtype)
    if K_pad != K:
        w_flat = jnp.pad(w_flat, ((0, K_pad - K), (0, 0)))
    bias2d = bias.reshape(1, E).astype(jnp.float32)

    # --- M tiling: big tiles for roofline, but keep >= 2 grid steps so the
    # "parallel" axis can shard across both v7x TensorCores.
    if M <= 8:
        tm = M                                          # single full-M tile
    else:
        tm = min(max(8, _round_up(tile_m, 8)),          # bf16 sublane packing
                 _round_up(pl.cdiv(M, 2), 8))           # >= 2 grid steps
    grid_m = pl.cdiv(M, tm)                             # ragged last tile OK

    # --- VMEM budget: double-buffered patch/out tiles + resident weight/bias,
    # x2 headroom, capped well below v7x's 64 MiB physical VMEM.
    in_b = jnp.dtype(compute_dtype).itemsize
    out_b = jnp.dtype(out_dtype).itemsize
    footprint = (2 * tm * K_pad * in_b       # patch tile, double-buffered
                 + 2 * tm * E * out_b        # output tile, double-buffered
                 + 2 * K_pad * E * in_b      # weight (resident)
                 + 2 * E * 4)                # bias
    vmem_limit = int(min(48 * 1024 * 1024,
                         max(16 * 1024 * 1024, 2 * footprint)))

    out = pl.pallas_call(
        _patch_embed_kernel,
        out_shape=jax.ShapeDtypeStruct((M, E), out_dtype),
        grid_spec=pltpu.PrefetchScalarGridSpec(
            num_scalar_prefetch=0,
            grid=(grid_m,),
            in_specs=[
                pl.BlockSpec((tm, K_pad), lambda i: (i, 0)),   # patch rows
                pl.BlockSpec((K_pad, E), lambda i: (0, 0)),    # weight, resident
                pl.BlockSpec((1, E), lambda i: (0, 0)),        # bias, resident
            ],
            out_specs=pl.BlockSpec((tm, E), lambda i: (i, 0)),
        ),
        compiler_params=pltpu.CompilerParams(
            dimension_semantics=("parallel",),
            vmem_limit_bytes=vmem_limit,
        ),
    )(patches, w_flat, bias2d)

    # Ragged last block is clipped by Pallas on writeback -> no [:M] slice.
    return out.reshape(B, NP, E)


def patch_embed_reference(x, weight, bias, *, patch_size):
    """Pure-JAX reference mirroring nn.Conv2d(stride=P) + flatten(2).transpose(1,2)."""
    P = patch_size
    y = lax.conv_general_dilated(
        x, weight, window_strides=(P, P), padding="VALID",
        dimension_numbers=("NCHW", "OIHW", "NCHW"))           # (B, E, Hp, Wp)
    y = y + bias.reshape(1, -1, 1, 1)
    B, E, Hp, Wp = y.shape
    return y.reshape(B, E, Hp * Wp).transpose(0, 2, 1)        # (B, NP, E)


if __name__ == "__main__":
    # Small shapes consistent with the module defaults: 20x12 image, patch 4,
    # in_chans 3; embed_dim kept small but MXU-aligned (multiple of 256).
    B, C_in, H, W = 2, 3, 20, 12
    P = 4
    E = 256

    key = jax.random.PRNGKey(0)
    kx, kw, kb = jax.random.split(key, 3)
    x = jax.random.normal(kx, (B, C_in, H, W), dtype=jnp.float32)
    weight = (0.05 * jax.random.normal(kw, (E, C_in, P, P))).astype(jnp.float32)
    bias = (0.05 * jax.random.normal(kb, (E,))).astype(jnp.float32)

    fwd = jax.jit(lambda xx, ww, bb: patch_embed_forward(xx, ww, bb, patch_size=P))
    out = jax.block_until_ready(fwd(x, weight, bias))

    ref = patch_embed_reference(x, weight, bias, patch_size=P)
    NP = (H // P) * (W // P)
    assert out.shape == (B, NP, E), out.shape
    # bf16 MXU operands + bf16 output with f32 accumulation -> relaxed tol.
    max_err = float(jnp.max(jnp.abs(out.astype(jnp.float32) - ref)))
    assert max_err < 3e-2, max_err

    print("KERNEL_OK")
</pallas_src>

<mosaic_0001>
module attributes {stable_mosaic.version = 11 : i64} {
  func.func @_patch_embed_kernel(%arg0: i32, %arg1: memref<16x128xbf16, #tpu.memory_space<vmem>>, %arg2: memref<128x256xbf16, #tpu.memory_space<vmem>>, %arg3: memref<1x256xf32, #tpu.memory_space<vmem>>, %arg4: memref<16x256xbf16, #tpu.memory_space<vmem>>) attributes {dimension_semantics = [#tpu.dimension_semantics<parallel>], iteration_bounds = array<i64: 2>, scalar_prefetch = 0 : i64, scratch_operands = 0 : i64, tpu.core_type = #tpu.core_type<tc>, window_params = [{transform_indices = @transform_0, window_bounds = array<i64: 16, 128>}, {pipeline_mode = #tpu.pipeline_mode<synchronous>, transform_indices = @transform_1, window_bounds = array<i64: 128, 256>}, {pipeline_mode = #tpu.pipeline_mode<synchronous>, transform_indices = @transform_2, window_bounds = array<i64: 1, 256>}, {transform_indices = @transform_3, window_bounds = array<i64: 16, 256>}]} {
    %c0 = arith.constant 0 : index
    %c0_0 = arith.constant 0 : index
    %0 = vector.load %arg1[%c0, %c0_0] : memref<16x128xbf16, #tpu.memory_space<vmem>>, vector<16x128xbf16>
    %c0_1 = arith.constant 0 : index
    %c0_2 = arith.constant 0 : index
    %1 = vector.load %arg2[%c0_1, %c0_2] : memref<128x256xbf16, #tpu.memory_space<vmem>>, vector<128x256xbf16>
    %cst = arith.constant dense<0.000000e+00> : vector<16x256xf32>
    %2 = tpu.matmul %0, %1, %cst {dimension_numbers = #tpu.dot_dimension_numbers<[1], [0], [0], [1], [0, 0, 1, 1], [], []>} : vector<16x128xbf16>, vector<128x256xbf16>, vector<16x256xf32> -> vector<16x256xf32>
    %c0_3 = arith.constant 0 : index
    %c0_4 = arith.constant 0 : index
    %3 = vector.load %arg3[%c0_3, %c0_4] : memref<1x256xf32, #tpu.memory_space<vmem>>, vector<1x256xf32>
    %4 = vector.broadcast %3 : vector<1x256xf32> to vector<16x256xf32>
    %5 = arith.addf %2, %4 : vector<16x256xf32>
    %6 = arith.truncf %5 : vector<16x256xf32> to vector<16x256xbf16>
    %c0_5 = arith.constant 0 : index
    %c0_6 = arith.constant 0 : index
    %7 = vector.load %arg4[%c0_5, %c0_6] : memref<16x256xbf16, #tpu.memory_space<vmem>>, vector<16x256xbf16>
    tpu.vector_store %arg4[%c0_5, %c0_6], %6 {strides = array<i32>} : memref<16x256xbf16, #tpu.memory_space<vmem>>, vector<16x256xbf16>,
    return
  }
  func.func @transform_0(%arg0: i32) -> (i32, i32) {
    %c0_i32 = arith.constant 0 : i32
    %c0_i32_0 = arith.constant 0 : i32
    return %arg0, %c0_i32 : i32, i32
  }
  func.func @transform_1(%arg0: i32) -> (i32, i32) {
    %c0_i32 = arith.constant 0 : i32
    %c0_i32_0 = arith.constant 0 : i32
    %c0_i32_1 = arith.constant 0 : i32
    return %c0_i32, %c0_i32_0 : i32, i32
  }
  func.func @transform_2(%arg0: i32) -> (i32, i32) {
    %c0_i32 = arith.constant 0 : i32
    %c0_i32_0 = arith.constant 0 : i32
    %c0_i32_1 = arith.constant 0 : i32
    return %c0_i32, %c0_i32_0 : i32, i32
  }
  func.func @transform_3(%arg0: i32) -> (i32, i32) {
    %c0_i32 = arith.constant 0 : i32
    %c0_i32_0 = arith.constant 0 : i32
    return %arg0, %c0_i32 : i32, i32
  }
}

</mosaic_0001>

<bundles_post_ra>
// kernel: _lambda_.1
= control target key start
LH: loop header
LB: loop body
LE: loop exit
PB: predicated region body
PF: predicated region fallthrough
CT: control target
= control target key end

     0   :  { %s505_s12 = smov 0   ;;  %s577_s0 = inlined_call_operand.vmem [shape: bf16[30,128], index: 0, kind: input, shape index: {}]   ;;  %s578_s1 = inlined_call_operand.vmem [shape: bf16[128,256], index: 1, kind: input, shape index: {}]   ;;  %s579_s2 = inlined_call_operand.vmem [shape: f32[1,256], index: 2, kind: input, shape index: {}]   ;;  %s580_s3 = inlined_call_operand.vmem [shape: bf16[30,256], index: 3, kind: output, shape index: {}]  }
   0x1 LB: > { %s408_s13 = sadd.s32 4294967295, %s482_s12   ;;  %p412_p0 = scmp.ge.s32.totalorder %s482_s12, 1  ;;  %s482_s12 = sphi %s505_s12, %s13_s12  }
   0x2   : > { %p138_p1 = scmp.lt.s32.totalorder %s482_s12, 3 }
   0x4   : > { %p139_p2 = pnand %p412_p0, %p138_p1 }
   0x5   : > { %v451_v0 = vld [vmem:[%s578_s1 + $0x4] ss:$8 sps:$4 sm:$0xff] (!%p139_p2)   ;;  %s413_s16 = sshll.u32 (!%p139_p2), %s408_s13, 1  ;;  %v453_v1 = vld [vmem:[%s578_s1] ss:$8 sps:$4 sm:$0xff] (!%p139_p2)   ;;  %v484_v2 = vmov (!%p139_p2), 0   ;;  %v197_v18 = vlaneseq (!%p139_p2) }
   0x6   : > { %142 = sbr.rel (%p139_p2) target bundleno = 258 (0x102), region = 32  ;;  %325 = vmatprep.mubr.bf16.mxu0 (!%p139_p2), %v484_v2  ;;  %p164_p3 = scmp.lt.s32.totalorder (!%p139_p2), %s413_s16, 3  ;;  %293 = vmatprep.subr.bf16.mxu0 (!%p139_p2), %v451_v0  ;;  %v454_v3 = vld [vmem:[%s578_s1 + $0x14] ss:$8 sps:$4 sm:$0xff] (!%p139_p2)   ;;  %v456_v4 = vld [vmem:[%s578_s1 + $0x10] ss:$8 sps:$4 sm:$0xff] (!%p139_p2)  }
   0x7   : > { %294 = vmatpush1.bf16.msra.mxu0 (!%p139_p2), %v453_v1  ;;  %v457_v5 = vld [vmem:[%s578_s1 + $0x24] ss:$8 sps:$4 sm:$0xff] (!%p139_p2)   ;;  %v459_v6 = vld [vmem:[%s578_s1 + $0x20] ss:$8 sps:$4 sm:$0xff] (!%p139_p2)   ;;  %v460_v7 = vld [vmem:[%s578_s1 + $0x34] ss:$8 sps:$4 sm:$0xff] (!%p139_p2)  }
   0x8   : > { %295 = vmatprep.subr.bf16.mxu0 (!%p139_p2), %v454_v3  ;;  %v462_v8 = vld [vmem:[%s578_s1 + $0x30] ss:$8 sps:$4 sm:$0xff] (!%p139_p2)   ;;  %v463_v9 = vld [vmem:[%s578_s1 + $0x44] ss:$8 sps:$4 sm:$0xff] (!%p139_p2)   ;;  %v465_v10 = vld [vmem:[%s578_s1 + $0x40] ss:$8 sps:$4 sm:$0xff] (!%p139_p2)  }
   0x9   : > { %v466_v11 = vld [vmem:[%s578_s1 + $0x54] ss:$8 sps:$4 sm:$0xff] (!%p139_p2)   ;;  %v468_v12 = vld [vmem:[%s578_s1 + $0x50] ss:$8 sps:$4 sm:$0xff] (!%p139_p2)   ;;  %v469_v13 = vld [vmem:[%s578_s1 + $0x64] ss:$8 sps:$4 sm:$0xff] (!%p139_p2)  }
   0xa   : > { %v471_v14 = vld [vmem:[%s578_s1 + $0x60] ss:$8 sps:$4 sm:$0xff] (!%p139_p2)   ;;  %v472_v15 = vld [vmem:[%s578_s1 + $0x74] ss:$8 sps:$4 sm:$0xff] (!%p139_p2)   ;;  %v474_v16 = vld [vmem:[%s578_s1 + $0x70] ss:$8 sps:$4 sm:$0xff] (!%p139_p2)  }
   0xb   : > { %296 = vmatpush1.bf16.msra.mxu0 (!%p139_p2), %v456_v4  ;;  %v198_v19 = vshrl.u32 (!%p139_p2), %v197_v18, 7  ;;  %v195_v21 = vld [vmem:[%s579_s2] sm:$0x3] (!%p139_p2) }
   0xc   : > { %297 = vmatprep.subr.bf16.mxu0 (!%p139_p2), %v457_v5 }
   0xd   : > { %s582_s16 = smov (!%p164_p3, %s413_s16), 3  ;;  %v199_v20 = vsub.s32 0, %v198_v19  ;;  %v203_v22 = vsub.s32 1, %v198_v19 }
   0xe   : > { %s414_s25 = sshll.u32 %s582_s16, 2  ;;  %s439_s28 = sshll.u32 %s582_s16, 3 }
   0xf   : > { %s167_s5 = scalar_lea.vmem %s577_s0, %s414_s25  ;;  %298 = vmatpush1.bf16.msra.mxu0 %v459_v6  ;;  %v200_v23 = vrot.slane %v195_v21, %v199_v20  ;;  %v204_v24 = vrot.slane %v195_v21, %v203_v22  ;;  %s174_s4 = scalar_lea.vmem %s580_s3, %s439_s28 }
  0x10   : > { %299 = vmatprep.subr.bf16.mxu0 %v460_v7  ;;  %v475_v17 = vld [vmem:[%s167_s5] sm:$0xff]  }
  0x13   : > { %300 = vmatpush1.bf16.msra.mxu0 %v462_v8 }
  0x14   : > { %301 = vmatprep.subr.bf16.mxu0 %v463_v9 }
  0x17   : > { %302 = vmatpush1.bf16.msra.mxu0 %v465_v10 }
  0x18   : > { %303 = vmatprep.subr.bf16.mxu0 %v466_v11 }
  0x1b   : > { %304 = vmatpush1.bf16.msra.mxu0 %v468_v12 }
  0x1c   : > { %305 = vmatprep.subr.bf16.mxu0 %v469_v13 }
  0x1f   : > { %306 = vmatpush1.bf16.msra.mxu0 %v471_v14 }
  0x20   : > { %307 = vmatprep.subr.bf16.mxu0 %v472_v15 }
  0x23   : > { %308 = vmatpush1.bf16.msra.mxu0 %v474_v16 }
  0x26   : > { %326 = vmatmul.mubr.bf16.vlgmr.msra.gmra.mrb[0].mxu0 %v475_v17 }
  0xf9   : > { %v327_v25 = vpop.f32.mrb[0].mxu0 }
  0xfa   : > { %v328_v26 = vadd.f32 %v327_v25, %v200_v23  ;;  %v329_v27 = vpop.f32.mrb[1].mxu0 }
  0xfb   : > { %v330_v28 = vadd.f32 %v329_v27, %v204_v24  ;;  %v331_v29 = vpop.f32.mrb[2].mxu0 }
  0xfc   : > { %v332_v30 = vadd.f32 %v331_v29, %v200_v23  ;;  %v333_v31 = vpop.f32.mrb[3].mxu0 }
  0xfd   : > { %v440_v32 = vpack.c.bf16 %v330_v28, %v328_v26  ;;  %v334_v33 = vadd.f32 %v333_v31, %v204_v24 }
  0xff   : > { %348 = vst [vmem:[%s174_s4] sm:$0xff] %v440_v32  ;;  %v441_v34 = vpack.c.bf16 %v334_v33, %v332_v30 }
 0x101   : > { %349 = vst [vmem:[%s174_s4 + $0x8] sm:$0xff] %v441_v34 }
 0x102 PF: > { %s13_s12 = sadd.s32 1, %s482_s12  }
 0x103   : > { %p10_p4 = scmp.ge.s32.totalorder %s13_s12, 4  }
 0x105   :  { %12 = sbr.rel (!%p10_p4) target bundleno = 1 (0x1), region = 62 }

</bundles_post_ra>
